<compile_context>
chip_gen: v7x
topology: tpu7x:2x2x1
jax: 0.10.0
libtpu: 0.0.40
codegen_flags: <defaults>
</compile_context>

<pallas_src>
import functools

import jax
import jax.numpy as jnp
from jax import lax
from jax.experimental import pallas as pl
from jax.experimental.pallas import tpu as pltpu


def _round_up(x: int, m: int) -> int:
    return ((x + m - 1) // m) * m


def fhe_linear_kernel(x_ref, w_ref, b_ref, o_ref, acc_ref):
    """One (tm, tn) output tile, accumulated over the K (in_dim) grid axis.

    x_ref: (tm, tk) int32   encoded/"encrypted" inputs
    w_ref: (tn, tk) int32   scale-rounded weights (row = output feature)
    b_ref: (1,  tn) int32   scale-rounded bias
    o_ref: (tm, tn) int32   output tile
    acc_ref: (tm, tn) f32   VMEM accumulator (persists across the k axis)
    """
    k = pl.program_id(2)

    @pl.when(k == 0)
    def _init():
        # Fold the bias into the accumulator init (broadcast over the tm rows).
        acc_ref[...] = jnp.broadcast_to(
            b_ref[...].astype(jnp.float32), acc_ref.shape
        )

    # MXU contraction over the shared K axis: (tm, tk) x (tn, tk) -> (tm, tn).
    acc_ref[...] += lax.dot_general(
        x_ref[...].astype(jnp.float32),
        w_ref[...].astype(jnp.float32),
        (((1,), (1,)), ((), ())),
        preferred_element_type=jnp.float32,
    )

    @pl.when(k == pl.num_programs(2) - 1)
    def _finalize():
        # Accumulator holds exact integers (see 2^24 note above) -> exact cast.
        o_ref[...] = acc_ref[...].astype(jnp.int32)


@functools.partial(jax.jit, static_argnames=("in_scale", "scale", "tm", "tn", "tk"))
def _fhe_linear_call(c_x, weight_int, true_bias, in_scale, scale, tm, tn, tk):
    B, I = c_x.shape
    O = weight_int.shape[0]

    # Bias encoding depends on the runtime in_scale -> plain-JAX glue.
    bias_int = jnp.round(
        jnp.asarray(true_bias, jnp.float32) * (in_scale * scale)
    ).astype(jnp.int32)

    # Clamp tiles to the (aligned) problem size, keep (8, 128) alignment.
    tm = min(tm, _round_up(B, 8))
    tn = min(tn, _round_up(O, 128))
    tk = min(tk, _round_up(I, 128))

    B_p = _round_up(B, tm)
    O_p = _round_up(O, tn)
    I_p = _round_up(I, tk)

    # Zero-pad once in the wrapper (layout plumbing, not compute): padded rows /
    # columns contribute exactly 0 to every accumulation.
    x_p = jnp.zeros((B_p, I_p), jnp.int32).at[:B, :I].set(c_x.astype(jnp.int32))
    w_p = jnp.zeros((O_p, I_p), jnp.int32).at[:O, :I].set(
        weight_int.astype(jnp.int32)
    )
    b_p = jnp.zeros((1, O_p), jnp.int32).at[0, :O].set(bias_int)

    grid = (B_p // tm, O_p // tn, I_p // tk)

    out_p = pl.pallas_call(
        fhe_linear_kernel,
        out_shape=jax.ShapeDtypeStruct((B_p, O_p), jnp.int32),
        grid_spec=pltpu.PrefetchScalarGridSpec(
            num_scalar_prefetch=0,
            grid=grid,
            in_specs=[
                pl.BlockSpec((tm, tk), lambda i, j, k: (i, k)),
                pl.BlockSpec((tn, tk), lambda i, j, k: (j, k)),
                pl.BlockSpec((1, tn), lambda i, j, k: (0, j)),
            ],
            out_specs=pl.BlockSpec((tm, tn), lambda i, j, k: (i, j)),
            scratch_shapes=[pltpu.VMEM((tm, tn), jnp.float32)],
        ),
        compiler_params=pltpu.CompilerParams(
            dimension_semantics=("parallel", "parallel", "arbitrary"),
            # Conservative limit valid on v5e/v6e (128 MiB) and v7x (64 MiB);
            # double-buffered tiles here are far below it.
            vmem_limit_bytes=32 * 1024 * 1024,
        ),
    )(x_p, w_p, b_p)

    return out_p[:B, :O]


def fhe_linear(c_x, in_scale, weight_int, true_bias, scale, *, tm=128, tn=128, tk=256):
    """Wrapper mirroring FHELinear.forward.

    c_x:        (B, I) or (I,) int32 encoded inputs
    in_scale:   python float, scale already applied to c_x
    weight_int: (O, I) int32, precomputed round(W * scale)
    true_bias:  (O,)   float32, the un-encoded bias
    scale:      python float, the layer's scale
    Returns (out_int32 [B, O], out_scale = in_scale * scale)
    """
    if c_x.ndim == 1:
        c_x = c_x[None, :]
    assert c_x.ndim == 2
    out = _fhe_linear_call(
        c_x, weight_int, true_bias, float(in_scale), float(scale), tm, tn, tk
    )
    return out, in_scale * scale


def _reference(c_x, weight_int, true_bias, in_scale, scale):
    bias_ref = jnp.round(
        jnp.asarray(true_bias, jnp.float32) * (in_scale * scale)
    ).astype(jnp.int32)
    return c_x.astype(jnp.int32) @ weight_int.astype(jnp.int32).T + bias_ref[None, :]


if __name__ == "__main__":
    key = jax.random.PRNGKey(0)

    # --- Test 1: toy shapes consistent with the original module ----------------
    k_w, k_b, k_x = jax.random.split(key, 3)
    batch, in_dim, out_dim = 4, 32, 16
    scale, in_scale = 100.0, 100.0

    w_float = jax.random.normal(k_w, (out_dim, in_dim), jnp.float32) * 0.1
    b_float = jax.random.normal(k_b, (out_dim,), jnp.float32) * 0.1
    weight_int = jnp.round(w_float * scale).astype(jnp.int32)

    x_float = jax.random.normal(k_x, (batch, in_dim), jnp.float32)
    c_x = jnp.round(x_float * in_scale).astype(jnp.int32)

    out, out_scale = fhe_linear(c_x, in_scale, weight_int, b_float, scale)
    out = jax.block_until_ready(out)

    ref = _reference(c_x, weight_int, b_float, in_scale, scale)
    assert out.shape == (batch, out_dim)
    assert out.dtype == jnp.int32
    assert out_scale == in_scale * scale
    assert jnp.array_equal(out, ref), "mismatch vs reference (toy)"

    # --- Test 2: larger, non-aligned shapes exercising the tiled (i,j,k) grid ---
    k_w2, k_b2, k_x2 = jax.random.split(jax.random.PRNGKey(1), 3)
    batch2, in_dim2, out_dim2 = 200, 384, 200
    scale2, in_scale2 = 100.0, 10.0

    w_float2 = jax.random.normal(k_w2, (out_dim2, in_dim2), jnp.float32) * 0.1
    b_float2 = jax.random.normal(k_b2, (out_dim2,), jnp.float32) * 0.1
    weight_int2 = jnp.round(w_float2 * scale2).astype(jnp.int32)

    x_float2 = jax.random.normal(k_x2, (batch2, in_dim2), jnp.float32)
    c_x2 = jnp.round(x_float2 * in_scale2).astype(jnp.int32)

    out2, out_scale2 = fhe_linear(c_x2, in_scale2, weight_int2, b_float2, scale2)
    out2 = jax.block_until_ready(out2)

    ref2 = _reference(c_x2, weight_int2, b_float2, in_scale2, scale2)
    assert out2.shape == (batch2, out_dim2)
    assert out_scale2 == in_scale2 * scale2
    assert jnp.array_equal(out2, ref2), "mismatch vs reference (tiled)"

    print("KERNEL_OK")
</pallas_src>

<mosaic_0001>
module attributes {stable_mosaic.version = 11 : i64} {
  func.func @fhe_linear_kernel(%arg0: i32, %arg1: i32, %arg2: i32, %arg3: memref<8x128xi32, #tpu.memory_space<vmem>>, %arg4: memref<128x128xi32, #tpu.memory_space<vmem>>, %arg5: memref<1x128xi32, #tpu.memory_space<vmem>>, %arg6: memref<8x128xi32, #tpu.memory_space<vmem>>, %arg7: memref<8x128xf32, #tpu.memory_space<vmem>>) attributes {dimension_semantics = [#tpu.dimension_semantics<parallel>, #tpu.dimension_semantics<parallel>, #tpu.dimension_semantics<arbitrary>], iteration_bounds = array<i64: 1, 1, 1>, scalar_prefetch = 0 : i64, scratch_operands = 1 : i64, tpu.core_type = #tpu.core_type<tc>, window_params = [{transform_indices = @transform_0, window_bounds = array<i64: 8, 128>}, {transform_indices = @transform_1, window_bounds = array<i64: 128, 128>}, {transform_indices = @transform_2, window_bounds = array<i64: 1, 128>}, {transform_indices = @transform_3, window_bounds = array<i64: 8, 128>}]} {
    %c0_i32 = arith.constant 0 : i32
    %0 = arith.cmpi eq, %arg2, %c0_i32 : i32
    %1 = arith.extui %0 : i1 to i32
    %c0_i32_0 = arith.constant 0 : i32
    %2 = arith.cmpi ne, %1, %c0_i32_0 : i32
    scf.if %2 {
      %c0_10 = arith.constant 0 : index
      %c0_11 = arith.constant 0 : index
      %14 = vector.load %arg5[%c0_10, %c0_11] : memref<1x128xi32, #tpu.memory_space<vmem>>, vector<1x128xi32>
      %15 = arith.sitofp %14 : vector<1x128xi32> to vector<1x128xf32>
      %16 = vector.shape_cast %15 : vector<1x128xf32> to vector<1x128xf32>
      %17 = vector.broadcast %16 : vector<1x128xf32> to vector<8x128xf32>
      %c0_12 = arith.constant 0 : index
      %c0_13 = arith.constant 0 : index
      %18 = vector.load %arg7[%c0_12, %c0_13] : memref<8x128xf32, #tpu.memory_space<vmem>>, vector<8x128xf32>
      tpu.vector_store %arg7[%c0_12, %c0_13], %17 {strides = array<i32>} : memref<8x128xf32, #tpu.memory_space<vmem>>, vector<8x128xf32>,
    } else {
    }
    %c0 = arith.constant 0 : index
    %c0_1 = arith.constant 0 : index
    %3 = vector.load %arg7[%c0, %c0_1] : memref<8x128xf32, #tpu.memory_space<vmem>>, vector<8x128xf32>
    %c0_2 = arith.constant 0 : index
    %c0_3 = arith.constant 0 : index
    %4 = vector.load %arg3[%c0_2, %c0_3] : memref<8x128xi32, #tpu.memory_space<vmem>>, vector<8x128xi32>
    %5 = arith.sitofp %4 : vector<8x128xi32> to vector<8x128xf32>
    %c0_4 = arith.constant 0 : index
    %c0_5 = arith.constant 0 : index
    %6 = vector.load %arg4[%c0_4, %c0_5] : memref<128x128xi32, #tpu.memory_space<vmem>>, vector<128x128xi32>
    %7 = arith.sitofp %6 : vector<128x128xi32> to vector<128x128xf32>
    %cst = arith.constant dense<0.000000e+00> : vector<8x128xf32>
    %8 = tpu.matmul %5, %7, %cst {dimension_numbers = #tpu.dot_dimension_numbers<[1], [1], [0], [0], [0, 0, 1, 0], [], []>} : vector<8x128xf32>, vector<128x128xf32>, vector<8x128xf32> -> vector<8x128xf32>
    %9 = arith.addf %3, %8 : vector<8x128xf32>
    %c0_6 = arith.constant 0 : index
    %c0_7 = arith.constant 0 : index
    %10 = vector.load %arg7[%c0_6, %c0_7] : memref<8x128xf32, #tpu.memory_space<vmem>>, vector<8x128xf32>
    tpu.vector_store %arg7[%c0_6, %c0_7], %9 {strides = array<i32>} : memref<8x128xf32, #tpu.memory_space<vmem>>, vector<8x128xf32>,
    %c0_i32_8 = arith.constant 0 : i32
    %11 = arith.cmpi eq, %arg2, %c0_i32_8 : i32
    %12 = arith.extui %11 : i1 to i32
    %c0_i32_9 = arith.constant 0 : i32
    %13 = arith.cmpi ne, %12, %c0_i32_9 : i32
    scf.if %13 {
      %c0_10 = arith.constant 0 : index
      %c0_11 = arith.constant 0 : index
      %14 = vector.load %arg7[%c0_10, %c0_11] : memref<8x128xf32, #tpu.memory_space<vmem>>, vector<8x128xf32>
      %15 = arith.fptosi %14 : vector<8x128xf32> to vector<8x128xi32>
      %c0_12 = arith.constant 0 : index
      %c0_13 = arith.constant 0 : index
      %16 = vector.load %arg6[%c0_12, %c0_13] : memref<8x128xi32, #tpu.memory_space<vmem>>, vector<8x128xi32>
      tpu.vector_store %arg6[%c0_12, %c0_13], %15 {strides = array<i32>} : memref<8x128xi32, #tpu.memory_space<vmem>>, vector<8x128xi32>,
    } else {
    }
    return
  }
  func.func @transform_0(%arg0: i32, %arg1: i32, %arg2: i32) -> (i32, i32) {
    %c0_i32 = arith.constant 0 : i32
    return %arg0, %arg2 : i32, i32
  }
  func.func @transform_1(%arg0: i32, %arg1: i32, %arg2: i32) -> (i32, i32) {
    %c0_i32 = arith.constant 0 : i32
    return %arg1, %arg2 : i32, i32
  }
  func.func @transform_2(%arg0: i32, %arg1: i32, %arg2: i32) -> (i32, i32) {
    %c0_i32 = arith.constant 0 : i32
    %c0_i32_0 = arith.constant 0 : i32
    return %c0_i32, %arg1 : i32, i32
  }
  func.func @transform_3(%arg0: i32, %arg1: i32, %arg2: i32) -> (i32, i32) {
    %c0_i32 = arith.constant 0 : i32
    return %arg0, %arg1 : i32, i32
  }
}

</mosaic_0001>

<bundles_post_ra>
// kernel: _fhe_linear_call.1
= control target key start
LH: loop header
LB: loop body
LE: loop exit
PB: predicated region body
PF: predicated region fallthrough
CT: control target
= control target key end

     0   :  { %v225_v0 = vmov 0.0|0.0   ;;  %vm226_vm0 = vmmov 0   ;;  %v227_v3 = vmov 0.0   ;;  %v21_v44 = vlaneseq  ;;  %s305_s1 = inlined_call_operand.vmem [shape: s32[128,128], index: 1, kind: input, shape index: {}]   ;;  %s306_s0 = inlined_call_operand.vmem [shape: s32[8,128], index: 0, kind: input, shape index: {}]   ;;  %s307_s2 = inlined_call_operand.vmem [shape: s32[1,128], index: 2, kind: input, shape index: {}]   ;;  %s308_s3 = inlined_call_operand.vmem [shape: s32[8,128], index: 3, kind: output, shape index: {}]  }
   0x1   :  { %196 = vmatprep.subr.bf16.mxu0 %v225_v0  ;;  %v30_v1 = vld [vmem:[%s305_s1] sm:$0xff]  ;;  %v31_v2 = vld [vmem:[%s305_s1 + $0x8] sm:$0xff]  ;;  %193 = vmatprep.mubr.msk.f32.mxu0 %vm226_vm0, %v227_v3  ;;  %v32_v6 = vld [vmem:[%s305_s1 + $0x10] sm:$0xff] }
   0x2   :  { %v46_v4 = vcvt.s32.f32 %v30_v1  ;;  %v47_v5 = vcvt.s32.f32 %v31_v2  ;;  %v33_v7 = vld [vmem:[%s305_s1 + $0x18] sm:$0xff]  ;;  %v48_v9 = vcvt.s32.f32 %v32_v6  ;;  %v34_v12 = vld [vmem:[%s305_s1 + $0x20] sm:$0xff]  ;;  %v35_v13 = vld [vmem:[%s305_s1 + $0x28] sm:$0xff]  ;;  %v22_v45 = vshrl.u32 %v21_v44, 7 }
   0x3   :  { %v49_v10 = vcvt.s32.f32 %v33_v7  ;;  %v50_v14 = vcvt.s32.f32 %v34_v12  ;;  %v51_v15 = vcvt.s32.f32 %v35_v13  ;;  %v36_v17 = vld [vmem:[%s305_s1 + $0x30] sm:$0xff]  ;;  %v37_v18 = vld [vmem:[%s305_s1 + $0x38] sm:$0xff]  ;;  %v38_v22 = vld [vmem:[%s305_s1 + $0x40] sm:$0xff] }
   0x4   :  { %v197_v8 = vpack.c.bf16 %v47_v5, %v46_v4  ;;  %v52_v19 = vcvt.s32.f32 %v36_v17  ;;  %v53_v20 = vcvt.s32.f32 %v37_v18  ;;  %v39_v23 = vld [vmem:[%s305_s1 + $0x48] sm:$0xff]  ;;  %v54_v24 = vcvt.s32.f32 %v38_v22  ;;  %v40_v27 = vld [vmem:[%s305_s1 + $0x50] sm:$0xff]  ;;  %v41_v28 = vld [vmem:[%s305_s1 + $0x58] sm:$0xff] }
   0x5   :  { %v200_v11 = vpack.c.bf16 %v49_v10, %v48_v9  ;;  %v203_v16 = vpack.c.bf16 %v51_v15, %v50_v14  ;;  %v55_v25 = vcvt.s32.f32 %v39_v23  ;;  %v56_v29 = vcvt.s32.f32 %v40_v27  ;;  %v42_v32 = vld [vmem:[%s305_s1 + $0x60] sm:$0xff]  ;;  %v43_v33 = vld [vmem:[%s305_s1 + $0x68] sm:$0xff]  ;;  %v44_v37 = vld [vmem:[%s305_s1 + $0x70] sm:$0xff] }
   0x6   :  { %198 = vmatpush3.bf16.xpose.msra.mxu0 %v197_v8  ;;  %v206_v21 = vpack.c.bf16 %v53_v20, %v52_v19  ;;  %v57_v30 = vcvt.s32.f32 %v41_v28  ;;  %v58_v34 = vcvt.s32.f32 %v42_v32  ;;  %v59_v35 = vcvt.s32.f32 %v43_v33  ;;  %v45_v38 = vld [vmem:[%s305_s1 + $0x78] sm:$0xff]  ;;  %v28_v42 = vld [vmem:[%s306_s0] sm:$0xff] }
   0x7   :  { %199 = vmatprep.subr.bf16.mxu0 %v225_v0  ;;  %v209_v26 = vpack.c.bf16 %v55_v25, %v54_v24  ;;  %v60_v39 = vcvt.s32.f32 %v44_v37  ;;  %v61_v40 = vcvt.s32.f32 %v45_v38  ;;  %v29_v43 = vcvt.s32.f32 %v28_v42  ;;  %v18_v46 = vld [vmem:[%s307_s2] sm:$0x1] }
   0x8   :  { %v212_v31 = vpack.c.bf16 %v57_v30, %v56_v29  ;;  %v215_v36 = vpack.c.bf16 %v59_v35, %v58_v34  ;;  %v19_v47 = vcvt.s32.f32 %v18_v46  ;;  %v23_v48 = vsub.s32 0, %v22_v45 }
   0x9   :  { %v218_v41 = vpack.c.bf16 %v61_v40, %v60_v39 }
   0xa   :  { %v24_v49 = vrot.slane %v19_v47, %v23_v48 }
   0xe   :  { %201 = vmatpush3.bf16.xpose.msra.mxu0 %v200_v11 }
   0xf   :  { %202 = vmatprep.subr.bf16.mxu0 %v225_v0 }
  0x16   :  { %204 = vmatpush3.bf16.xpose.msra.mxu0 %v203_v16 }
  0x17   :  { %205 = vmatprep.subr.bf16.mxu0 %v225_v0 }
  0x1e   :  { %207 = vmatpush3.bf16.xpose.msra.mxu0 %v206_v21 }
  0x1f   :  { %208 = vmatprep.subr.bf16.mxu0 %v225_v0 }
  0x26   :  { %210 = vmatpush3.bf16.xpose.msra.mxu0 %v209_v26 }
  0x27   :  { %211 = vmatprep.subr.bf16.mxu0 %v225_v0 }
  0x2e   :  { %213 = vmatpush3.bf16.xpose.msra.mxu0 %v212_v31 }
  0x2f   :  { %214 = vmatprep.subr.bf16.mxu0 %v225_v0 }
  0x36   :  { %216 = vmatpush3.bf16.xpose.msra.mxu0 %v215_v36 }
  0x37   :  { %217 = vmatprep.subr.bf16.mxu0 %v225_v0 }
  0x3e   :  { %219 = vmatpush3.bf16.xpose.msra.mxu0 %v218_v41 }
  0x45   :  { %194 = vmatmul.mubr.f32.vlgmr.msra.gmra.mrb[0].mxu0 %v29_v43 }
 0x118   :  { %v128_v50 = vpop.f32.mrb[0].mxu0 }
 0x119   :  { %v132_v51 = vadd.f32 %v128_v50, %v24_v49  ;;  %v195_v52 = vpop.f32.mrb[1].mxu0 }
 0x11b   :  { %v220_v53 = vtrunc.f32 %v132_v51 }
 0x11d   :  { %v221_v54 = vcvt.f32.s32 %v220_v53 }
 0x11f   :  { %139 = vst [vmem:[%s308_s3] sm:$0xff] %v221_v54 }

</bundles_post_ra>
